<compile_context>
chip_gen: v7x
topology: tpu7x:2x2x1
jax: 0.10.0
libtpu: 0.0.40
codegen_flags: <defaults>
</compile_context>

<pallas_src>
import jax
import jax.numpy as jnp
import numpy as np
from jax.experimental import pallas as pl
from jax.experimental.pallas import tpu as pltpu

MAX_BLOCK_BYTES = 2 * 1024 * 1024      # ~2 MiB per block
_LANE_CANDIDATES = (512, 256, 128)     # lane-dense minor dims (even, %128 == 0)


def _round_up(x, m):
    return ((x + m - 1) // m) * m


def _fixed_gap_kernel(origin_ref, o_ref, out_ref):
    """origin_ref: (1,1) f32 in SMEM; o_ref/out_ref: (block_rows, LANES) f32 VMEM.

    Flat row-major order of an (N, 2) array is [o0x, o0y, o1x, o1y, ...].
    LANES is even, so a flat element's parity equals its lane parity: subtract
    `origin` on odd lanes, 0 on even lanes.  The offset is built at vreg width
    (1, LANES) and broadcast along sublanes — pure VPU work, no XLU, no
    per-block 2 MiB constant.
    """
    lanes = o_ref.shape[-1]
    lane = jax.lax.broadcasted_iota(jnp.int32, (1, lanes), 1)
    gap = origin_ref[0, 0]
    offset = jnp.where((lane & 1) == 1, gap, jnp.float32(0.0))
    out_ref[...] = o_ref[...] - offset


def fixed_gap(ray_origins, ray_vectors, origin):
    """Pallas TPU implementation of FixedGap.forward((origins, vectors)).

    Returns (ray_origins - [0.0, origin], ray_vectors).
    """
    assert ray_origins.ndim == 2 and ray_origins.shape[1] == 2
    num_rays = ray_origins.shape[0]
    total = num_rays * 2

    in_dtype = ray_origins.dtype
    x = ray_origins if in_dtype == jnp.float32 else ray_origins.astype(jnp.float32)
    origin_arr = jnp.asarray(origin, jnp.float32).reshape(1, 1)

    # Pick the widest lane-dense minor dim that divides 2N -> copy-free path
    # for any N % 64 == 0.  Otherwise fall back to a small pad (<128 elems).
    lanes = None
    for cand in _LANE_CANDIDATES:
        if total % cand == 0:
            lanes = cand
            break
    ragged = lanes is None
    if ragged:
        lanes = _LANE_CANDIDATES[-1]

    flat = x.reshape(-1)                       # free: row-major bitcast
    if ragged:
        # TODO(synk): fully copy-free ragged path (prefix kernel + tail fixup)
        # — the pad and the final slice below each cost an extra HBM pass.
        pad = (-total) % lanes
        flat = jnp.pad(flat, (0, pad))
    rows = flat.shape[0] // lanes
    view = flat.reshape(rows, lanes)           # free: row-major bitcast

    max_block_rows = MAX_BLOCK_BYTES // (lanes * 4)
    if rows <= 8:
        block_rows = rows                      # single full-extent block
    else:
        # At least two grid steps so v7x megacore can shard the "parallel" axis.
        block_rows = min(max_block_rows, _round_up(pl.cdiv(rows, 2), 8))
    grid = (pl.cdiv(rows, block_rows),)

    out = pl.pallas_call(
        _fixed_gap_kernel,
        out_shape=jax.ShapeDtypeStruct((rows, lanes), jnp.float32),
        grid=grid,
        in_specs=[
            pl.BlockSpec(memory_space=pltpu.MemorySpace.SMEM),   # origin scalar
            pl.BlockSpec((block_rows, lanes), lambda i: (i, 0)),
        ],
        out_specs=pl.BlockSpec((block_rows, lanes), lambda i: (i, 0)),
        compiler_params=pltpu.CompilerParams(
            dimension_semantics=("parallel",)),
    )(origin_arr, view)

    if ragged:
        new_origins = out.reshape(-1)[:total].reshape(num_rays, 2)
    else:
        new_origins = out.reshape(num_rays, 2)  # free: row-major bitcast
    if new_origins.dtype != in_dtype:
        new_origins = new_origins.astype(in_dtype)
    # ray_vectors pass through unchanged (same semantics as the torch module).
    return new_origins, ray_vectors


def _reference(ray_origins, ray_vectors, origin):
    """Pure-JAX reference mirroring the PyTorch module semantics."""
    return (ray_origins - jnp.array([0.0, origin], jnp.float32), ray_vectors)


if __name__ == "__main__":
    key = jax.random.PRNGKey(0)
    origin = 5.0

    # Three cases:
    #  * N=256  : lane-aligned, single block, fully copy-free
    #  * N=2560 : lane-aligned, rows > 8 -> 2 grid steps + partial last block
    #  * N=200  : ragged (2N=400), exercises the pad/slice fallback
    for num_rays in (256, 2560, 200):
        k1, k2 = jax.random.split(jax.random.fold_in(key, num_rays))
        ray_origins = jax.random.normal(k1, (num_rays, 2), jnp.float32) * 3.0
        raw_dirs = jax.random.normal(k2, (num_rays, 2), jnp.float32)
        ray_vectors = raw_dirs / jnp.linalg.norm(raw_dirs, axis=1,
                                                 keepdims=True)

        new_o, new_v = fixed_gap(ray_origins, ray_vectors, origin)
        new_o = jax.block_until_ready(new_o)
        new_v = jax.block_until_ready(new_v)

        ref_o, ref_v = _reference(ray_origins, ray_vectors, origin)
        np.testing.assert_allclose(np.asarray(new_o), np.asarray(ref_o),
                                   rtol=1e-6, atol=1e-6)
        np.testing.assert_array_equal(np.asarray(new_v), np.asarray(ref_v))

    print("KERNEL_OK")
</pallas_src>

<mosaic_0001>
module attributes {stable_mosaic.version = 11 : i64} {
  func.func @_fixed_gap_kernel(%arg0: i32, %arg1: memref<1x1xf32, #tpu.memory_space<smem>>, %arg2: memref<1x512xf32, #tpu.memory_space<vmem>>, %arg3: memref<1x512xf32, #tpu.memory_space<vmem>>) attributes {dimension_semantics = [#tpu.dimension_semantics<parallel>], iteration_bounds = array<i64: 1>, scalar_prefetch = 0 : i64, scratch_operands = 0 : i64, tpu.core_type = #tpu.core_type<tc>, window_params = [{transform_indices = @transform_0, window_bounds = array<i64: 1, 1>}, {transform_indices = @transform_1, window_bounds = array<i64: 1, 512>}, {transform_indices = @transform_2, window_bounds = array<i64: 1, 512>}]} {
    %0 = tpu.iota {dimensions = array<i32: 1>} : vector<1x512xi32>
    %c0 = arith.constant 0 : index
    %c0_0 = arith.constant 0 : index
    %1 = memref.load %arg1[%c0, %c0_0] : memref<1x1xf32, #tpu.memory_space<smem>>
    %c1_i32 = arith.constant 1 : i32
    %2 = vector.broadcast %c1_i32 : i32 to vector<1x512xi32>
    %3 = arith.andi %0, %2 : vector<1x512xi32>
    %c1_i32_1 = arith.constant 1 : i32
    %4 = vector.broadcast %c1_i32_1 : i32 to vector<1x512xi32>
    %5 = arith.cmpi eq, %3, %4 : vector<1x512xi32>
    %cst = arith.constant 0.000000e+00 : f32
    %6 = vector.broadcast %1 : f32 to vector<1x512xf32>
    %7 = vector.broadcast %cst : f32 to vector<1x512xf32>
    %8 = arith.select %5, %6, %7 : vector<1x512xi1>, vector<1x512xf32>
    %c0_2 = arith.constant 0 : index
    %c0_3 = arith.constant 0 : index
    %9 = vector.load %arg2[%c0_2, %c0_3] : memref<1x512xf32, #tpu.memory_space<vmem>>, vector<1x512xf32>
    %10 = arith.subf %9, %8 : vector<1x512xf32>
    %c0_4 = arith.constant 0 : index
    %c0_5 = arith.constant 0 : index
    %11 = vector.load %arg3[%c0_4, %c0_5] : memref<1x512xf32, #tpu.memory_space<vmem>>, vector<1x512xf32>
    tpu.vector_store %arg3[%c0_4, %c0_5], %10 {strides = array<i32>} : memref<1x512xf32, #tpu.memory_space<vmem>>, vector<1x512xf32>,
    return
  }
  func.func @transform_0(%arg0: i32) -> (i32, i32) {
    %c0_i32 = arith.constant 0 : i32
    %c0_i32_0 = arith.constant 0 : i32
    %c0_i32_1 = arith.constant 0 : i32
    return %c0_i32, %c0_i32_0 : i32, i32
  }
  func.func @transform_1(%arg0: i32) -> (i32, i32) {
    %c0_i32 = arith.constant 0 : i32
    %c0_i32_0 = arith.constant 0 : i32
    return %arg0, %c0_i32 : i32, i32
  }
  func.func @transform_2(%arg0: i32) -> (i32, i32) {
    %c0_i32 = arith.constant 0 : i32
    %c0_i32_0 = arith.constant 0 : i32
    return %arg0, %c0_i32 : i32, i32
  }
}

</mosaic_0001>

<bundles_post_ra>
// kernel: tpu_custom_call.1
= control target key start
LH: loop header
LB: loop body
LE: loop exit
PB: predicated region body
PF: predicated region fallthrough
CT: control target
= control target key end

     0   :  { %8 = vsyncpa [#allocation4], 0  ;;  %s191_s0 = inlined_call_operand.<no memory space> [shape: f32[1,1], index: 0, kind: input, shape index: {}]   ;;  %s192_s1 = inlined_call_operand.hbm [shape: f32[1,512], index: 1, kind: input, shape index: {}]   ;;  %s193_s2 = inlined_call_operand.hbm [shape: f32[1,512], index: 2, kind: output, shape index: {}]  }
   0x1   :  { %9 = vsyncpa [#allocation5], 0  ;;  %s146_s9 = smov [#allocation3]   ;;  %s98_s13 = scalar_lea.hbm %s192_s1, 64 }
   0x2   :  { %s18_s10 = sshll.u32 %s146_s9, 4  ;;  %p99_p0 = scmp.ne.s32.totalorder %s192_s1, %s98_s13  ;;  %s19_s10 = int_to_ptr.vmem [resolvable:$true] %s18_s10 }
   0x3   :  { %p102_p1 = scmp.lt.u32.totalorder %s98_s13, %s192_s1 }
   0x5   :  { %p104_p2 = pnand %p102_p1, %p99_p0 }
   0x7   :  { %107 = shalt.err (!%p104_p2)
}
   0x8   :  { %s108_s18 = scalar_lea.vmem %s19_s10, 64  ;;  %p113_p4 = scmp.lt.s32.totalorder %s19_s10, %s19_s10 }
   0x9   :  { %p109_p3 = scmp.ne.s32.totalorder %s19_s10, %s108_s18  ;;  %p114_p5 = scmp.lt.s32.totalorder %s108_s18, %s108_s18 }
   0xb   :  { %p115_p6 = por %p114_p5, %p113_p4 }
   0xd   :  { %p116_p7 = pnand %p115_p6, %p109_p3 }
   0xf   :  { %119 = shalt.err (!%p116_p7)
}
  0x10   :  { %21 = dma.hbm_to_vmem [thread:$0]  %s192_s1, 64, %s19_s10, [#allocation4]  }
  0x11   :  { %142 = dma.done.wait [#allocation4], 64  }
  0x12   :  { %143 = vsyncadd [#allocation4], 4294967232  ;;  %v25_v0 = vlaneseq  ;;  %v147_v1 = vmov 1966171168   ;;  %v39_v4 = vstv %s191_s0  ;;  %v44_v24 = vld [vmem:[#allocation3] sm:$0xf] }
  0x13   :  { %v52_v2 = vunpack.c.l.s4 %v147_v1  ;;  %s148_s0 = smov [#allocation6]  }
  0x14   :  { %v26_v3 = vand.u32 127, %v25_v0  ;;  %v55_v6 = vshrl.u32 %v25_v0, 7  ;;  %s86_s1 = sshll.u32 %s148_s0, 4  ;;  %vm77_vm4 = vcmp.lt.s32.totalorder %v25_v0, 512  ;;  %s87_s1 = int_to_ptr.vmem [resolvable:$true] %s86_s1 }
  0x15   :  { %v53_v5 = vunpack.c.0.s8 %v52_v2  ;;  %s120_s23 = scalar_lea.vmem %s87_s1, 64  ;;  %p125_p9 = scmp.lt.s32.totalorder %s87_s1, %s87_s1 }
  0x16   :  { %v27_v7 = vadd.s32 128, %v26_v3  ;;  %v28_v8 = vadd.s32 256, %v26_v3  ;;  %v29_v9 = vadd.s32 384, %v26_v3  ;;  %v31_v10 = vand.u32 1, %v26_v3  ;;  %p121_p8 = scmp.ne.s32.totalorder %s87_s1, %s120_s23  ;;  %p126_p10 = scmp.lt.s32.totalorder %s120_s23, %s120_s23 }
  0x17   :  { %v56_v15 = vsub.s32 %v53_v5, %v55_v6 }
  0x18   :  { %v32_v11 = vand.u32 1, %v27_v7  ;;  %v33_v12 = vand.u32 1, %v28_v8  ;;  %v34_v13 = vand.u32 1, %v29_v9  ;;  %vm35_vm0 = vcmp.eq.s32.totalorder %v31_v10, 1  ;;  %p127_p11 = por %p126_p10, %p125_p9 }
  0x19   :  { %v40_v14 = vsel %vm35_vm0, %v39_v4, 0.0 }
  0x1a   :  { %vm36_vm1 = vcmp.eq.s32.totalorder %v32_v11, 1  ;;  %vm37_vm2 = vcmp.eq.s32.totalorder %v33_v12, 1  ;;  %vm38_vm3 = vcmp.eq.s32.totalorder %v34_v13, 1  ;;  %p128_p12 = pnand %p127_p11, %p121_p8 }
  0x1b   :  { %v41_v16 = vsel %vm36_vm1, %v39_v4, 0.0  ;;  %v42_v17 = vsel %vm37_vm2, %v39_v4, 0.0  ;;  %v43_v18 = vsel %vm38_vm3, %v39_v4, 0.0 }
  0x1c   :  { %v49_v19 = vcombine.low %v40_v14, %v41_v16  ;;  %v50_v20 = vcombine.low %v42_v17, %v43_v18 }
  0x1e   :  { %v57_v21 = vrot.slane %v49_v19, %v56_v15  ;;  %v64_v22 = vrot.slane %v50_v20, %v56_v15 }
  0x20   :  { %v65_v23 = vcombine.low %v57_v21, %v64_v22 }
  0x22   :  { %v72_v25 = vrot.slane %v65_v23, %v56_v15 }
  0x24   :  { %v74_v26 = vsub.f32 %v44_v24, %v72_v25 }
  0x26   :  { %79 = vst.msk [vmem:[#allocation6] sm:$0xf] %vm77_vm4, %v74_v26 }
  0x27   :  { %131 = shalt.err (!%p128_p12)
}
  0x28   :  { %s132_s26 = scalar_lea.hbm %s193_s2, 64 }
  0x29   :  { %p133_p13 = scmp.ne.s32.totalorder %s193_s2, %s132_s26  ;;  %p136_p0 = scmp.lt.u32.totalorder %s132_s26, %s193_s2 }
  0x2b   :  { %p138_p1 = pnand %p136_p0, %p133_p13 }
  0x2d   :  { %141 = shalt.err (!%p138_p1)
}
  0x2e   :  { %89 = dma.vmem_to_hbm [thread:$0]  %s87_s1, 64, %s193_s2, [#allocation5]  }
  0x2f   :  { %144 = dma.done.wait [#allocation5], 64  }
  0x30   :  { %145 = vsyncadd [#allocation5], 4294967232 }
  0x31   :  { %93 = vsyncpa [#allocation4], 1 }
  0x32   :  { %94 = vsyncpa [#allocation5], 1 }

</bundles_post_ra>
